<compile_context>
chip_gen: v7x
topology: tpu7x:2x2x1
jax: 0.10.0
libtpu: 0.0.40
codegen_flags: <defaults>
</compile_context>

<pallas_src>
import jax
import jax.numpy as jnp
from jax.experimental import pallas as pl
from jax.experimental.pallas import tpu as pltpu

_LANES = 128                 # vreg lane width
_SUBLANES = 8                # vreg sublane height (f32)
_TARGET_TILE_BYTES = 2 << 20  # ~2 MiB per tile: amortizes per-step overhead,
                              # 4 live double-buffered tiles stay well under
                              # the scoped VMEM limit on v5e/v6e/v7x.


def _identity_kernel(x_ref, o_ref):
    # Pass-through of the current tile: BaseAttention.forward(graph) == graph.
    o_ref[...] = x_ref[...]


def base_attention_forward(x: jax.Array) -> jax.Array:
    """Pallas implementation of BaseAttention.forward (identity)."""
    orig_shape = x.shape
    orig_dtype = x.dtype

    # --- choose a lane-dense 2D view ------------------------------------
    if x.ndim == 0:
        x2d = x.reshape(1, 1)
    elif x.size % _LANES == 0:
        # Lane-dense path: last dim == 128 -> full-vreg, unmasked stores.
        x2d = x.reshape(-1, _LANES)
    elif x.ndim >= 2:
        # Fallback: keep the original last dim (full-extent last block dim is
        # always legal); still tile rows so large tensors never OOM VMEM.
        x2d = x.reshape(-1, orig_shape[-1])
    else:
        x2d = x.reshape(1, -1)

    R, C = x2d.shape

    # --- choose a row tile (~2 MiB, multiple of 8 sublanes) ---------------
    bytes_per_row = max(C * x2d.dtype.itemsize, 1)
    tile_r = (_TARGET_TILE_BYTES // bytes_per_row) // _SUBLANES * _SUBLANES
    tile_r = max(tile_r, _SUBLANES)
    if tile_r >= R:
        tile_r = R            # single full-extent block (always legal)
        grid = (1,)
    else:
        grid = (pl.cdiv(R, tile_r),)   # ragged last tile is masked by Pallas

    out2d = pl.pallas_call(
        _identity_kernel,
        out_shape=jax.ShapeDtypeStruct((R, C), orig_dtype),
        grid=grid,
        in_specs=[pl.BlockSpec((tile_r, C), lambda i: (i, 0))],
        out_specs=pl.BlockSpec((tile_r, C), lambda i: (i, 0)),
        # Output aliases the input: no extra HBM allocation for the identity.
        input_output_aliases={0: 0},
        compiler_params=pltpu.CompilerParams(
            # "parallel" lets v7x shard the row-copy over both TensorCores;
            # harmless on single-TC v5e/v6e.
            dimension_semantics=("parallel",),
        ),
    )(x2d)

    return out2d.reshape(orig_shape)


if __name__ == "__main__":
    key = jax.random.PRNGKey(0)
    # Small NCHW-like "graph" feature tensor: batch=2, channels=4, 16x16 spatial.
    x = jax.random.normal(key, (2, 4, 16, 16), dtype=jnp.float32)

    fwd = jax.jit(base_attention_forward)
    y = fwd(x)
    y = jax.block_until_ready(y)

    assert y.shape == x.shape and y.dtype == x.dtype
    assert bool(jnp.array_equal(y, x))

    print("KERNEL_OK")
</pallas_src>

<mosaic_0001>
module attributes {stable_mosaic.version = 11 : i64} {
  func.func @_identity_kernel(%arg0: i32, %arg1: memref<16x128xf32, #tpu.memory_space<vmem>>, %arg2: memref<16x128xf32, #tpu.memory_space<vmem>>) attributes {dimension_semantics = [#tpu.dimension_semantics<parallel>], iteration_bounds = array<i64: 1>, scalar_prefetch = 0 : i64, scratch_operands = 0 : i64, tpu.core_type = #tpu.core_type<tc>, window_params = [{transform_indices = @transform_0, window_bounds = array<i64: 16, 128>}, {transform_indices = @transform_1, window_bounds = array<i64: 16, 128>}]} {
    %c0 = arith.constant 0 : index
    %c0_0 = arith.constant 0 : index
    %0 = vector.load %arg1[%c0, %c0_0] : memref<16x128xf32, #tpu.memory_space<vmem>>, vector<16x128xf32>
    %c0_1 = arith.constant 0 : index
    %c0_2 = arith.constant 0 : index
    %1 = vector.load %arg2[%c0_1, %c0_2] : memref<16x128xf32, #tpu.memory_space<vmem>>, vector<16x128xf32>
    tpu.vector_store %arg2[%c0_1, %c0_2], %0 {strides = array<i32>} : memref<16x128xf32, #tpu.memory_space<vmem>>, vector<16x128xf32>,
    return
  }
  func.func @transform_0(%arg0: i32) -> (i32, i32) {
    %c0_i32 = arith.constant 0 : i32
    %c0_i32_0 = arith.constant 0 : i32
    return %arg0, %c0_i32 : i32, i32
  }
  func.func @transform_1(%arg0: i32) -> (i32, i32) {
    %c0_i32 = arith.constant 0 : i32
    %c0_i32_0 = arith.constant 0 : i32
    return %arg0, %c0_i32 : i32, i32
  }
}

</mosaic_0001>

<bundles_post_ra>
// kernel: base_attention_forward.1
= control target key start
LH: loop header
LB: loop body
LE: loop exit
PB: predicated region body
PF: predicated region fallthrough
CT: control target
= control target key end

     0   :  { %s38_s0 = inlined_call_operand.vmem [shape: f32[16,128], index: 0, kind: input, shape index: {}, may-alias: {0,1}]   ;;  %s39_s1 = inlined_call_operand.vmem [shape: f32[16,128], index: 1, kind: output, shape index: {}, may-alias: {0,1}]  }
   0x1   :  { %v8_v0 = vld [vmem:[%s38_s0] sm:$0xff]  ;;  %v9_v1 = vld [vmem:[%s38_s0 + $0x8] sm:$0xff] }
   0x2   :  { %10 = vst [vmem:[%s39_s1] sm:$0xff] %v8_v0  ;;  %11 = vst [vmem:[%s39_s1 + $0x8] sm:$0xff] %v9_v1 }

</bundles_post_ra>
